<compile_context>
chip_gen: v6e
topology: v6e:2x2x1
jax: 0.10.0
libtpu: 0.0.40
codegen_flags: <defaults>
</compile_context>

<pallas_src>
import jax
import jax.numpy as jnp
from jax.experimental import pallas as pl
from jax.experimental.pallas import tpu as pltpu


def _round_down(v, m):
    return (v // m) * m


def _cdiv(a, b):
    return -(-a // b)


_HAS_BUFFERED = hasattr(pl, "Buffered")


def _spec(shape, index_map, buffer_count=None):
    """BlockSpec, optionally with an explicit buffer count (Buffered(1) for
    grid-invariant operands).  Falls back to the default pipeline if the
    installed Pallas does not expose pipeline_mode."""
    if buffer_count is not None and _HAS_BUFFERED:
        try:
            return pl.BlockSpec(shape, index_map,
                                pipeline_mode=pl.Buffered(buffer_count))
        except TypeError:
            pass
    return pl.BlockSpec(shape, index_map)


def _vmem_budget_bytes():
    """~75% of per-core VMEM: ~96 MiB on v5e/v6e (128 MiB), ~48 MiB on v7x (64 MiB)."""
    cap = 64 * 1024 * 1024  # conservative fallback (v7x per-TC VMEM)
    try:
        cap = int(pltpu.get_tpu_info().vmem_capacity_bytes)
    except Exception:
        pass
    return (cap * 3) // 4


def cross_prod_mean_kernel(x_ref, wa_ref, ba_ref, wbm_ref, bbm_ref, o_ref):
    # x_ref:   (tm, dim)   token tile, original dtype (f32 or bf16)
    # wa_ref:  (dim, tn)   Wa^T with the gain g folded in (bf16 by default)
    # ba_ref:  (1, tn)     ba * g                              (f32)
    # wbm_ref: (1, dim)    mean over hid of Wb rows            (f32)
    # bbm_ref: (1, 1)      mean(bb)                            (f32)
    # o_ref:   (tm, tn)
    x = x_ref[...]

    # One MXU matmul, f32 accumulation.  The activation cast to the (bf16)
    # weight dtype happens here in VMEM -- no extra HBM pass in the wrapper.
    a = jnp.dot(x.astype(wa_ref.dtype), wa_ref[...],
                preferred_element_type=jnp.float32) + ba_ref[...]

    # mean(b, -1) per row == x . mean_h(Wb) + mean(bb): one VPU multiply plus an
    # XLU cross-lane reduce replaces the whole second matmul.  Kept in f32.
    mean_b = (jnp.sum(x.astype(jnp.float32) * wbm_ref[...],
                      axis=-1, keepdims=True) + bbm_ref[...])

    # f32 epilogue (v5e has no bf16 VPU); single cast at the store.
    o_ref[...] = (a * mean_b).astype(o_ref.dtype)


def prepare_cross_prod_mean_params(wa, ba, wb, bb, g, *, compute_dtype=jnp.bfloat16):
    """Fold gain/bias into the A projection and pre-average the B projection.

    Hoist this out of the forward hot path (compute once per weight update).
    wa/wb: (hid, dim) PyTorch nn.Linear layout; ba/bb/g: (hid,).
    """
    g32 = g.astype(jnp.float32)
    wa_g = wa.T.astype(jnp.float32) * g32[None, :]            # (dim, hid)
    ba_g = (ba.astype(jnp.float32) * g32)[None, :]            # (1, hid)
    wbm = jnp.mean(wb.astype(jnp.float32), axis=0)[None, :]   # (1, dim)
    bbm = jnp.mean(bb.astype(jnp.float32)).reshape(1, 1)      # (1, 1)
    if compute_dtype is not None:
        wa_g = wa_g.astype(compute_dtype)                     # MXU weight dtype
    return wa_g, ba_g, wbm, bbm


def _select_tiles(M, dim, hid, x_isz, w_isz, o_isz, tm_req, tn_req, budget):
    # ---- row tile: whole M if small, otherwise a multiple of 8 ----
    if tm_req is None:
        tm_req = 1024 if budget >= (72 << 20) else 512   # v5e/v6e vs v7x
    tm = M if M <= tm_req else max(8, _round_down(tm_req, 8))

    # ---- hid tile: keep the whole hid resident unless the weight slab is big ----
    if tn_req is not None:
        tn = hid if tn_req >= hid else max(128, _round_down(tn_req, 128))
    elif dim * hid * w_isz <= budget // 3 or hid <= 256:
        tn = hid
    else:
        tn = max(128, _round_down((budget // 3) // (dim * w_isz), 128))
        tn = min(tn, _round_down(hid, 128))

    def usage(tm_, tn_):
        n_j = _cdiv(hid, tn_)
        wbuf = 1 if n_j == 1 else 2          # Buffered(1) when grid-invariant
        return (2 * tm_ * dim * x_isz        # x tile, double-buffered
                + 2 * tm_ * tn_ * o_isz      # out tile, double-buffered
                + wbuf * (dim * tn_ * w_isz + tn_ * 4)   # wa_g + ba_g blocks
                + (dim + 1) * 4              # wbm + bbm
                + tm_ * tn_ * 4              # f32 matmul result
                + tm_ * dim * 4 + tm_ * 4)   # f32 x copy for mean_b + mean_b

    while tm > 256 and usage(tm, tn) > budget:
        tm = max(256, _round_down(tm // 2, 8))
    return tm, tn, usage(tm, tn)


def cross_prod_mean_prepared(x, wa_g, ba_g, wbm, bbm, *, tm=None, tn=None):
    """x: (B, N, dim); prepared params from prepare_cross_prod_mean_params."""
    B, N, dim = x.shape
    hid = wa_g.shape[1]
    M = B * N
    out_dtype = x.dtype

    budget = _vmem_budget_bytes()
    x_isz = jnp.dtype(x.dtype).itemsize
    w_isz = jnp.dtype(wa_g.dtype).itemsize
    o_isz = jnp.dtype(out_dtype).itemsize
    tm_eff, tn_eff, vmem_needed = _select_tiles(
        M, dim, hid, x_isz, w_isz, o_isz, tm, tn, budget)

    n_i = pl.cdiv(M, tm_eff)     # ragged last row block: Pallas masks the store
    n_j = pl.cdiv(hid, tn_eff)   # ragged last hid block: Pallas masks the store
    w_buf = 1 if n_j == 1 else 2  # single-buffer weights only when grid-invariant

    # No jnp.pad of x (would be an extra full HBM pass); flat token view only.
    x2 = x.reshape(M, dim)

    # hid axis innermost so the x block index (i, 0) is unchanged across it and
    # the x tile is not re-DMA'd.
    grid = (n_i, n_j)

    out2 = pl.pallas_call(
        cross_prod_mean_kernel,
        out_shape=jax.ShapeDtypeStruct((M, hid), out_dtype),
        grid_spec=pltpu.PrefetchScalarGridSpec(
            num_scalar_prefetch=0,
            grid=grid,
            in_specs=[
                _spec((tm_eff, dim), lambda i, j: (i, 0)),          # x tile
                _spec((dim, tn_eff), lambda i, j: (0, j), w_buf),   # Wa^T * g
                _spec((1, tn_eff), lambda i, j: (0, j), w_buf),     # ba * g
                _spec((1, dim), lambda i, j: (0, 0), 1),            # mean(Wb, 0)
                _spec((1, 1), lambda i, j: (0, 0), 1),              # mean(bb)
            ],
            out_specs=pl.BlockSpec((tm_eff, tn_eff), lambda i, j: (i, j)),
        ),
        compiler_params=pltpu.CompilerParams(
            dimension_semantics=("parallel", "arbitrary"),  # megacore on tokens
            vmem_limit_bytes=int(min(budget,
                                     max(32 * 1024 * 1024, 2 * vmem_needed))),
        ),
    )(x2, wa_g, ba_g, wbm, bbm)

    return out2.reshape(B, N, hid)


def cross_prod_mean(x, wa, ba, wb, bb, g, *, tm=None, tn=None,
                    compute_dtype=jnp.bfloat16):
    """One-shot convenience wrapper.  For serving, hoist the param prep and call
    cross_prod_mean_prepared directly (prep is per-weight-update, not per-token)."""
    params = prepare_cross_prod_mean_params(wa, ba, wb, bb, g,
                                            compute_dtype=compute_dtype)
    return cross_prod_mean_prepared(x, *params, tm=tm, tn=tn)


def cross_prod_mean_ref(x, wa, ba, wb, bb, g):
    """Pure-JAX reference matching the PyTorch forward exactly."""
    a = jnp.einsum("bnd,hd->bnh", x, wa) + ba
    b = jnp.einsum("bnd,hd->bnh", x, wb) + bb
    outer = jnp.einsum("bni,bnj->bnij", a, b)
    return g * outer.mean(-1)


if __name__ == "__main__":
    key = jax.random.PRNGKey(0)

    def make_inputs(k, B, N, dim, hid):
        kx, kwa, kba, kwb, kbb, kg = jax.random.split(k, 6)
        x = jax.random.normal(kx, (B, N, dim), dtype=jnp.float32)
        wa = jax.random.normal(kwa, (hid, dim), dtype=jnp.float32) * (1.0 / dim ** 0.5)
        ba = jax.random.normal(kba, (hid,), dtype=jnp.float32) * 0.01
        wb = jax.random.normal(kwb, (hid, dim), dtype=jnp.float32) * (1.0 / dim ** 0.5)
        bb = jax.random.normal(kbb, (hid,), dtype=jnp.float32) * 0.01
        g = jax.random.normal(kg, (hid,), dtype=jnp.float32)
        return x, wa, ba, wb, bb, g

    k1, k2 = jax.random.split(key)

    # 1) Small ViT-like shape: N=17 exercises the ragged-row path, hid=32 the
    #    unpadded (lane-masked) output path.  f32 compute -> tight check.
    B, N, dim, hid = 2, 17, 32, 32
    x, wa, ba, wb, bb, g = make_inputs(k1, B, N, dim, hid)
    ref = cross_prod_mean_ref(x, wa, ba, wb, bb, g)

    out_f32 = jax.block_until_ready(
        cross_prod_mean(x, wa, ba, wb, bb, g, compute_dtype=jnp.float32))
    assert out_f32.shape == (B, N, hid)
    assert jnp.allclose(out_f32, ref, atol=1e-4, rtol=1e-4), "f32 mismatch vs reference"

    # 2) Default bf16 MXU-input path (f32 accumulation / f32 epilogue).
    out_bf16 = jax.block_until_ready(cross_prod_mean(x, wa, ba, wb, bb, g))
    assert out_bf16.shape == (B, N, hid)
    assert jnp.allclose(out_bf16, ref, atol=5e-2, rtol=5e-2), "bf16 mismatch vs reference"

    # 3) Force a multi-tile grid (3 ragged row blocks x 2 hid blocks) to exercise
    #    the tiled / masked code paths at a small shape.
    B2, N2, dim2, hid2 = 2, 17, 32, 256
    x2_, wa2, ba2, wb2, bb2, g2 = make_inputs(k2, B2, N2, dim2, hid2)
    ref2 = cross_prod_mean_ref(x2_, wa2, ba2, wb2, bb2, g2)
    out_tiled = jax.block_until_ready(
        cross_prod_mean(x2_, wa2, ba2, wb2, bb2, g2, tm=16, tn=128,
                        compute_dtype=jnp.float32))
    assert out_tiled.shape == (B2, N2, hid2)
    assert jnp.allclose(out_tiled, ref2, atol=1e-4, rtol=1e-4), "tiled mismatch vs reference"

    print("KERNEL_OK")
</pallas_src>

<mosaic_0001>
module attributes {stable_mosaic.version = 11 : i64} {
  func.func @cross_prod_mean_kernel(%arg0: i32, %arg1: i32, %arg2: memref<34x32xf32, #tpu.memory_space<vmem>>, %arg3: memref<32x32xf32, #tpu.memory_space<vmem>>, %arg4: memref<1x32xf32, #tpu.memory_space<vmem>>, %arg5: memref<1x32xf32, #tpu.memory_space<vmem>>, %arg6: memref<1x1xf32, #tpu.memory_space<vmem>>, %arg7: memref<34x32xf32, #tpu.memory_space<vmem>>) attributes {dimension_semantics = [#tpu.dimension_semantics<parallel>, #tpu.dimension_semantics<arbitrary>], iteration_bounds = array<i64: 1, 1>, scalar_prefetch = 0 : i64, scratch_operands = 0 : i64, tpu.core_type = #tpu.core_type<tc>, window_params = [{transform_indices = @transform_0, window_bounds = array<i64: 34, 32>}, {pipeline_mode = #tpu.pipeline_mode<synchronous>, transform_indices = @transform_1, window_bounds = array<i64: 32, 32>}, {pipeline_mode = #tpu.pipeline_mode<synchronous>, transform_indices = @transform_2, window_bounds = array<i64: 1, 32>}, {pipeline_mode = #tpu.pipeline_mode<synchronous>, transform_indices = @transform_3, window_bounds = array<i64: 1, 32>}, {pipeline_mode = #tpu.pipeline_mode<synchronous>, transform_indices = @transform_4, window_bounds = array<i64: 1, 1>}, {transform_indices = @transform_5, window_bounds = array<i64: 34, 32>}]} {
    %c0 = arith.constant 0 : index
    %c0_0 = arith.constant 0 : index
    %0 = vector.load %arg2[%c0, %c0_0] : memref<34x32xf32, #tpu.memory_space<vmem>>, vector<34x32xf32>
    %c0_1 = arith.constant 0 : index
    %c0_2 = arith.constant 0 : index
    %1 = vector.load %arg3[%c0_1, %c0_2] : memref<32x32xf32, #tpu.memory_space<vmem>>, vector<32x32xf32>
    %cst = arith.constant dense<0.000000e+00> : vector<34x32xf32>
    %2 = tpu.matmul %0, %1, %cst {dimension_numbers = #tpu.dot_dimension_numbers<[1], [0], [0], [1], [0, 0, 1, 1], [], []>} : vector<34x32xf32>, vector<32x32xf32>, vector<34x32xf32> -> vector<34x32xf32>
    %c0_3 = arith.constant 0 : index
    %c0_4 = arith.constant 0 : index
    %3 = vector.load %arg4[%c0_3, %c0_4] : memref<1x32xf32, #tpu.memory_space<vmem>>, vector<1x32xf32>
    %4 = vector.broadcast %3 : vector<1x32xf32> to vector<34x32xf32>
    %5 = arith.addf %2, %4 : vector<34x32xf32>
    %c0_5 = arith.constant 0 : index
    %c0_6 = arith.constant 0 : index
    %6 = vector.load %arg5[%c0_5, %c0_6] : memref<1x32xf32, #tpu.memory_space<vmem>>, vector<1x32xf32>
    %7 = vector.broadcast %6 : vector<1x32xf32> to vector<34x32xf32>
    %8 = arith.mulf %0, %7 : vector<34x32xf32>
    %cst_7 = arith.constant dense<0.000000e+00> : vector<34xf32>
    %9 = vector.multi_reduction <add>, %8, %cst_7 [1] : vector<34x32xf32> to vector<34xf32>
    %10 = vector.shape_cast %9 : vector<34xf32> to vector<34x1xf32>
    %c0_8 = arith.constant 0 : index
    %c0_9 = arith.constant 0 : index
    %11 = vector.load %arg6[%c0_8, %c0_9] : memref<1x1xf32, #tpu.memory_space<vmem>>, vector<1x1xf32>
    %12 = vector.broadcast %11 : vector<1x1xf32> to vector<34x1xf32>
    %13 = arith.addf %10, %12 : vector<34x1xf32>
    %14 = vector.broadcast %13 : vector<34x1xf32> to vector<34x32xf32>
    %15 = arith.mulf %5, %14 : vector<34x32xf32>
    %c0_10 = arith.constant 0 : index
    %c0_11 = arith.constant 0 : index
    %16 = vector.load %arg7[%c0_10, %c0_11] : memref<34x32xf32, #tpu.memory_space<vmem>>, vector<34x32xf32>
    tpu.vector_store %arg7[%c0_10, %c0_11], %15 {strides = array<i32>} : memref<34x32xf32, #tpu.memory_space<vmem>>, vector<34x32xf32>,
    return
  }
  func.func @transform_0(%arg0: i32, %arg1: i32) -> (i32, i32) {
    %c0_i32 = arith.constant 0 : i32
    %c0_i32_0 = arith.constant 0 : i32
    return %arg0, %c0_i32 : i32, i32
  }
  func.func @transform_1(%arg0: i32, %arg1: i32) -> (i32, i32) {
    %c0_i32 = arith.constant 0 : i32
    %c0_i32_0 = arith.constant 0 : i32
    return %c0_i32, %arg1 : i32, i32
  }
  func.func @transform_2(%arg0: i32, %arg1: i32) -> (i32, i32) {
    %c0_i32 = arith.constant 0 : i32
    %c0_i32_0 = arith.constant 0 : i32
    return %c0_i32, %arg1 : i32, i32
  }
  func.func @transform_3(%arg0: i32, %arg1: i32) -> (i32, i32) {
    %c0_i32 = arith.constant 0 : i32
    %c0_i32_0 = arith.constant 0 : i32
    %c0_i32_1 = arith.constant 0 : i32
    return %c0_i32, %c0_i32_0 : i32, i32
  }
  func.func @transform_4(%arg0: i32, %arg1: i32) -> (i32, i32) {
    %c0_i32 = arith.constant 0 : i32
    %c0_i32_0 = arith.constant 0 : i32
    %c0_i32_1 = arith.constant 0 : i32
    return %c0_i32, %c0_i32_0 : i32, i32
  }
  func.func @transform_5(%arg0: i32, %arg1: i32) -> (i32, i32) {
    %c0_i32 = arith.constant 0 : i32
    return %arg0, %arg1 : i32, i32
  }
}

</mosaic_0001>

<bundles_post_ra>
// kernel: tpu_custom_call.1
= control target key start
LH: loop header
LB: loop body
LE: loop exit
PB: predicated region body
PF: predicated region fallthrough
CT: control target
= control target key end

     0   :  { %vm38_vm0 = vcmask 261120   ;;  %v276_v3 = vmov 0.0   ;;  %vm277_vm1 = vmmov 0   ;;  %vm168_vm2 = vcmask 254976   ;;  %s380_s0 = inlined_call_operand.vmem [shape: f32[34,32], index: 0, kind: input, shape index: {}]   ;;  %s381_s3 = inlined_call_operand.vmem [shape: f32[1,32], index: 3, kind: input, shape index: {}]   ;;  %s382_s1 = inlined_call_operand.vmem [shape: f32[32,32], index: 1, kind: input, shape index: {}]   ;;  %s383_s4 = inlined_call_operand.<no memory space> [shape: f32[1,1], index: 4, kind: input, shape index: {}]   ;;  %s384_s2 = inlined_call_operand.vmem [shape: f32[1,32], index: 2, kind: input, shape index: {}]   ;;  %s385_s5 = inlined_call_operand.vmem [shape: f32[34,32], index: 5, kind: output, shape index: {}]  }
   0x1   :  { %v22_v0 = vld [vmem:[%s380_s0] sm:$0xff]  ;;  %v24_v2 = vld [vmem:[%s380_s0 + $0x10] sm:$0xff]  ;;  %240 = vmatprep.subr.mxu0 %v276_v3  ;;  %248 = vmatprep.mubr.msk.f32.mxu0 %vm277_vm1, %v276_v3  ;;  %v10_v4 = vstv %s383_s4  ;;  %v25_v7 = vld [vmem:[%s380_s0 + $0x18] sm:$0xff]  ;;  %v278_v22 = vmov 0  }
   0x2   :  { %v229_v1 = vld [vmem:[%s381_s3] ss:$0 sm:$0xff]  ;;  %v23_v8 = vld [vmem:[%s380_s0 + $0x8] sm:$0xff]  ;;  %263 = vmatprep.subr.mxu1 %v276_v3  ;;  %257 = vmatprep.mubr.msk.f32.mxu1 %vm277_vm1, %v276_v3  ;;  %11 = vst [vmem:[#allocation2] sm:$0x1] %v10_v4  ;;  %v30_v12 = vld [vmem:[%s382_s1 + $0x18] sm:$0xff] }
   0x3   :  { %v151_v5 = vmul.f32 %v229_v1, %v22_v0  ;;  %v153_v6 = vmul.f32 %v229_v1, %v24_v2  ;;  %v154_v9 = vmul.f32 %v229_v1, %v25_v7  ;;  %v152_v10 = vmul.f32 %v229_v1, %v23_v8  ;;  %v26_v11 = vld [vmem:[%s380_s0 + $0x20] sm:$0x3]  ;;  %241 = vmatpush3.msra.mxu0 %v30_v12  ;;  %v29_v15 = vld [vmem:[%s382_s1 + $0x10] sm:$0xff]  ;;  %v28_v19 = vld [vmem:[%s382_s1 + $0x8] sm:$0xff] }
   0x4   :  { %267 = vmatpush3.msra.mxu1 %v30_v12  ;;  %v155_v18 = vmul.f32 %v229_v1, %v26_v11  ;;  %242 = vmatprep.subr.mxu0 %v276_v3  ;;  %v27_v20 = vld [vmem:[%s382_s1] sm:$0xff] }
   0x5   :  { %v156_v13 = vsel %vm38_vm0, %v151_v5, 0.0  ;;  %v162_v14 = vsel %vm38_vm0, %v153_v6, 0.0  ;;  %v165_v16 = vsel %vm38_vm0, %v154_v9, 0.0  ;;  %v159_v17 = vsel %vm38_vm0, %v152_v10, 0.0  ;;  %264 = vmatprep.subr.mxu1 %v276_v3  ;;  %243 = vmatpush3.msra.mxu0 %v29_v15  ;;  %v223_v44 = vld [vmem:[%s384_s2] ss:$0 sm:$0xff] }
   0x6   :  { %157 = vadd.xlane.f32.xlu0 %v156_v13  ;;  %163 = vadd.xlane.f32.xlu1 %v162_v14  ;;  %v169_v21 = vsel %vm168_vm2, %v155_v18, 0.0 }
   0x7   :  { %268 = vmatpush3.msra.mxu1 %v29_v15  ;;  %244 = vmatprep.subr.mxu0 %v276_v3 }
   0x8   :  { %265 = vmatprep.subr.mxu1 %v276_v3  ;;  %245 = vmatpush3.msra.mxu0 %v28_v19 }
   0x9   :  { %269 = vmatpush3.msra.mxu1 %v28_v19  ;;  %246 = vmatprep.subr.mxu0 %v276_v3  ;;  %v230_v23 = vld [vmem:[#allocation2] ss:$0 sm:$0xff] }
   0xa   :  { %166 = vadd.xlane.f32.xlu1 %v165_v16  ;;  %160 = vadd.xlane.f32.xlu0 %v159_v17 }
   0xb   :  { %266 = vmatprep.subr.mxu1 %v276_v3  ;;  %247 = vmatpush3.msra.mxu0 %v27_v20 }
   0xc   :  { %270 = vmatpush3.msra.mxu1 %v27_v20  ;;  %249 = vmatmul.mubr.msk.f32.vlgmr.msra.gmra.mxu0 %vm38_vm0, %v22_v0 }
   0xd   :  { %251 = vmatprep.mubr.msk.f32.mxu0 %vm277_vm1, %v276_v3  ;;  %258 = vmatmul.mubr.msk.f32.vlgmr.msra.gmra.mxu1 %vm38_vm0, %v25_v7 }
   0xe   :  { %170 = vadd.xlane.f32.xlu0 %v169_v21  ;;  %260 = vmatprep.mubr.msk.f32.mxu1 %vm277_vm1, %v276_v3 }
   0xf   :  { %274 = vset.pattern.permute.xlu1 %v278_v22  ;;  %275 = vset.pattern.permute.xlu0 %v278_v22 }
  0x10   :  { %252 = vmatmul.mubr.msk.f32.gmra.mxu0 %vm38_vm0, %v23_v8 }
  0x11   :  { %254 = vmatprep.mubr.msk.f32.mxu0 %vm277_vm1, %v276_v3  ;;  %261 = vmatmul.mubr.msk.f32.gmra.mxu1 %vm38_vm0, %v26_v11 }
  0x14   :  { %255 = vmatmul.mubr.msk.f32.gmra.mxu0 %vm38_vm0, %v24_v2 }
  0x8f   :  { %v158_v24 = vpop.xlane.xlu0 %157  ;;  %v164_v25 = vpop.xlane.xlu1 %163 }
  0x90   :  { %v179_v26 = vadd.f32 %v230_v23, %v158_v24  ;;  %v181_v27 = vadd.f32 %v230_v23, %v164_v25 }
  0x92   :  { %186 = vperm.xlu1 %274, %v179_v26  }
  0x93   :  { %v167_v28 = vpop.xlane.xlu1 %166  ;;  %v161_v29 = vpop.xlane.xlu0 %160 }
  0x94   :  { %v180_v30 = vadd.f32 %v230_v23, %v161_v29  ;;  %v182_v31 = vadd.f32 %v230_v23, %v167_v28 }
  0x96   :  { %196 = vperm.xlu1 %274, %v181_v27   ;;  %191 = vperm.xlu0 %275, %v180_v30  }
  0x97   :  { %v171_v32 = vpop.xlane.xlu0 %170 }
  0x98   :  { %v183_v33 = vadd.f32 %v230_v23, %v171_v32 }
  0x9a   :  { %201 = vperm.xlu1 %274, %v182_v31  }
  0x9e   :  { %206 = vperm.xlu1 %274, %v183_v33  }
  0xcc   :  { %v120_v34 = vpop.f32.mrf.mxu0 }
  0xcd   :  { %v135_v35 = vpop.f32.mrf.mxu1  ;;  %v121_v45 = vadd.f32 %v223_v44, %v120_v34 }
  0xce   :  { %v250_v36 = vpop.f32.mrf.mxu0  ;;  %v136_v52 = vadd.f32 %v223_v44, %v135_v35 }
  0xcf   :  { %v259_v37 = vpop.f32.mrf.mxu1 }
  0xd0   :  { %v125_v38 = vpop.f32.mrf.mxu0 }
  0xd1   :  { %v140_v39 = vpop.f32.mrf.mxu1  ;;  %v126_v47 = vadd.f32 %v223_v44, %v125_v38 }
  0xd2   :  { %v253_v40 = vpop.f32.mrf.mxu0  ;;  %v141_v56 = vadd.f32 %v223_v44, %v140_v39 }
  0xd3   :  { %v262_v41 = vpop.f32.mrf.mxu1 }
  0xd4   :  { %v130_v42 = vpop.f32.mrf.mxu0 }
  0xd5   :  { %v131_v49 = vadd.f32 %v223_v44, %v130_v42 }
  0xd6   :  { %v256_v43 = vpop.f32.mrf.mxu0 }
 0x10d   :  { %v187_v46 = vpop.permute.xlu1 %186 }
 0x10e   :  { %v209_v48 = vmul.f32 %v187_v46, %v121_v45 }
 0x110   :  { %214 = vst.msk [vmem:[%s385_s5] sm:$0xff] %vm38_vm0, %v209_v48 }
 0x111   :  { %v197_v50 = vpop.permute.xlu1 %196  ;;  %v192_v51 = vpop.permute.xlu0 %191 }
 0x112   :  { %v211_v53 = vmul.f32 %v197_v50, %v131_v49  ;;  %v210_v54 = vmul.f32 %v192_v51, %v126_v47 }
 0x114   :  { %216 = vst.msk [vmem:[%s385_s5 + $0x10] sm:$0xff] %vm38_vm0, %v211_v53  ;;  %215 = vst.msk [vmem:[%s385_s5 + $0x8] sm:$0xff] %vm38_vm0, %v210_v54 }
 0x115   :  { %v202_v55 = vpop.permute.xlu1 %201 }
 0x116   :  { %v212_v57 = vmul.f32 %v202_v55, %v136_v52 }
 0x118   :  { %217 = vst.msk [vmem:[%s385_s5 + $0x18] sm:$0xff] %vm38_vm0, %v212_v57 }
 0x119   :  { %v207_v58 = vpop.permute.xlu1 %206 }
 0x11a   :  { %v213_v59 = vmul.f32 %v207_v58, %v141_v56 }
 0x11c   :  { %218 = vst.msk [vmem:[%s385_s5 + $0x20] sm:$0x3] %vm168_vm2, %v213_v59 }

</bundles_post_ra>
